<compile_context>
chip_gen: v7x
topology: tpu7x:2x2x1
jax: 0.10.0
libtpu: 0.0.40
codegen_flags: <defaults>
</compile_context>

<pallas_src>
import functools

import jax
import jax.numpy as jnp
from jax.experimental import pallas as pl
from jax.experimental.pallas import tpu as pltpu

_LANES = 128
_SUBLANES = 8


def _round_up(x, m):
    return ((x + m - 1) // m) * m


def _ce_label_smooth_kernel(x_ref, t_ref, out_ref, *, epsilon, num_classes,
                            batch, block_b):
    # x_ref  : (TB, Kpad) float  VMEM block (padded classes)
    # t_ref  : (TB, 1)    int32  VMEM block (padded rows hold 0)
    # out_ref: (1, 8, 128) f32   per-tile partial sum, broadcast over the block
    i = pl.program_id(0)

    x = x_ref[...].astype(jnp.float32)                      # (TB, Kpad)
    tb, kpad = x.shape
    labels = t_ref[...]                                     # (TB, 1) int32

    col_idx = jax.lax.broadcasted_iota(jnp.int32, (tb, kpad), 1)
    col_ok = col_idx < num_classes                          # mask padded classes

    # numerically stable pieces of log-softmax (padded cols -> -inf -> exp 0)
    xm = jnp.where(col_ok, x, -jnp.inf)
    row_max = jnp.max(xm, axis=1, keepdims=True)            # (TB, 1)
    shifted = xm - row_max                                   # (TB, Kpad)
    lse = jnp.log(jnp.sum(jnp.exp(shifted), axis=1, keepdims=True))  # (TB, 1)

    # sum_j shifted_ij over real classes, and shifted[i, target_i] via masked reduce
    sum_shifted = jnp.sum(jnp.where(col_ok, shifted, 0.0), axis=1, keepdims=True)
    tgt_shifted = jnp.sum(jnp.where(col_idx == labels, shifted, 0.0),
                          axis=1, keepdims=True)

    # loss_i = -(1-eps)*(shifted[t_i]-lse_i) - (eps/K)*(sum_shifted_i - K*lse_i)
    k_f = jnp.float32(num_classes)
    eps = jnp.float32(epsilon)
    loss_row = (-(1.0 - eps) * (tgt_shifted - lse)
                - (eps / k_f) * (sum_shifted - k_f * lse))   # (TB, 1)

    # mask padded batch rows
    row_idx = i * block_b + jax.lax.broadcasted_iota(jnp.int32, (tb, 1), 0)
    loss_row = jnp.where(row_idx < batch, loss_row, 0.0)

    partial = jnp.sum(loss_row)
    out_ref[...] = jnp.full((1, _SUBLANES, _LANES), partial, dtype=jnp.float32)


def _pick_block_b(batch, kpad, itemsize, target_block_bytes=4 * 1024 * 1024):
    # ~4 MiB per logits block: comfortably double-buffered on v5e/v6e/v7x
    # scoped-VMEM defaults while large enough to amortize per-step overhead.
    rows = target_block_bytes // max(1, kpad * itemsize)
    rows = max(16, (rows // 16) * 16)          # multiple of 16 (bf16-safe)
    rows = min(rows, 1024)
    rows = min(rows, _round_up(batch, 16))
    return int(rows)


def cross_entropy_label_smooth(inputs, targets, num_classes, epsilon=0.1,
                               block_b=None):
    """inputs: (B, K) float logits; targets: (B,) int labels. Returns scalar f32."""
    b, k = inputs.shape
    assert k == num_classes

    kpad = _round_up(k, _LANES)                # lane-dense class axis
    itemsize = jnp.dtype(inputs.dtype).itemsize
    if block_b is None:
        block_b = _pick_block_b(b, kpad, itemsize)
    bpad = _round_up(b, block_b)
    num_tiles = bpad // block_b

    x = inputs
    if bpad != b or kpad != k:
        x = jnp.pad(x, ((0, bpad - b), (0, kpad - k)))
    t = targets.astype(jnp.int32).reshape(-1, 1)
    if bpad != b:
        t = jnp.pad(t, ((0, bpad - b), (0, 0)))

    kernel = functools.partial(
        _ce_label_smooth_kernel,
        epsilon=float(epsilon),
        num_classes=int(num_classes),
        batch=int(b),
        block_b=int(block_b),
    )

    partials = pl.pallas_call(
        kernel,
        out_shape=jax.ShapeDtypeStruct((num_tiles, _SUBLANES, _LANES), jnp.float32),
        grid=(num_tiles,),
        in_specs=[
            pl.BlockSpec((block_b, kpad), lambda i: (i, 0)),   # logits tile
            pl.BlockSpec((block_b, 1), lambda i: (i, 0)),      # labels tile
        ],
        out_specs=pl.BlockSpec((1, _SUBLANES, _LANES), lambda i: (i, 0, 0)),
        compiler_params=pltpu.CompilerParams(
            dimension_semantics=("parallel",),
        ),
    )(x, t)

    # final reduce of per-tile partials + mean over batch
    return jnp.sum(partials[:, 0, 0]) / jnp.float32(b)


def _reference(inputs, targets, num_classes, epsilon=0.1):
    x = inputs.astype(jnp.float32)
    log_probs = jax.nn.log_softmax(x, axis=1)
    onehot = jax.nn.one_hot(targets, num_classes, dtype=jnp.float32)
    smooth = (1.0 - epsilon) * onehot + epsilon / num_classes
    return (-smooth * log_probs).mean(0).sum()


if __name__ == "__main__":
    key = jax.random.PRNGKey(0)

    # Test 1: small shapes matching the module spec (B=8, K=16).
    batch, num_classes, epsilon = 8, 16, 0.1
    k_logits, k_labels, key = jax.random.split(key, 3)
    logits = jax.random.normal(k_logits, (batch, num_classes), dtype=jnp.float32)
    labels = jax.random.randint(k_labels, (batch,), 0, num_classes, dtype=jnp.int32)

    loss = jax.block_until_ready(
        cross_entropy_label_smooth(logits, labels, num_classes, epsilon))
    ref = _reference(logits, labels, num_classes, epsilon)
    assert jnp.allclose(loss, ref, rtol=1e-5, atol=1e-5), (loss, ref)

    # Test 2: ragged shapes that exercise batch tiling + row/col padding masks.
    batch2, num_classes2 = 40, 200
    k_logits2, k_labels2, key = jax.random.split(key, 3)
    logits2 = jax.random.normal(k_logits2, (batch2, num_classes2), dtype=jnp.float32)
    labels2 = jax.random.randint(k_labels2, (batch2,), 0, num_classes2, dtype=jnp.int32)

    loss2 = jax.block_until_ready(
        cross_entropy_label_smooth(logits2, labels2, num_classes2, epsilon,
                                   block_b=16))
    ref2 = _reference(logits2, labels2, num_classes2, epsilon)
    assert jnp.allclose(loss2, ref2, rtol=1e-5, atol=1e-5), (loss2, ref2)

    print("KERNEL_OK")
</pallas_src>

<mosaic_0001>
module attributes {stable_mosaic.version = 11 : i64} {
  func.func @_ce_label_smooth_kernel(%arg0: i32, %arg1: memref<16x128xf32, #tpu.memory_space<vmem>>, %arg2: memref<16x1xi32, #tpu.memory_space<vmem>>, %arg3: memref<1x8x128xf32, #tpu.memory_space<vmem>>) attributes {dimension_semantics = [#tpu.dimension_semantics<parallel>], iteration_bounds = array<i64: 1>, scalar_prefetch = 0 : i64, scratch_operands = 0 : i64, tpu.core_type = #tpu.core_type<tc>, window_params = [{transform_indices = @transform_0, window_bounds = array<i64: 16, 128>}, {transform_indices = @transform_1, window_bounds = array<i64: 16, 1>}, {transform_indices = @transform_2, window_bounds = array<i64: 1, 8, 128>}]} {
    %c0 = arith.constant 0 : index
    %c0_0 = arith.constant 0 : index
    %0 = vector.load %arg1[%c0, %c0_0] : memref<16x128xf32, #tpu.memory_space<vmem>>, vector<16x128xf32>
    %c0_1 = arith.constant 0 : index
    %c0_2 = arith.constant 0 : index
    %1 = vector.load %arg2[%c0_1, %c0_2] : memref<16x1xi32, #tpu.memory_space<vmem>>, vector<16x1xi32>
    %2 = tpu.iota {dimensions = array<i32: 1>} : vector<16x128xi32>
    %c16_i32 = arith.constant 16 : i32
    %3 = vector.broadcast %c16_i32 : i32 to vector<16x128xi32>
    %4 = arith.cmpi slt, %2, %3 : vector<16x128xi32>
    %cst = arith.constant 0xFF800000 : f32
    %5 = vector.broadcast %cst : f32 to vector<16x128xf32>
    %6 = arith.select %4, %0, %5 : vector<16x128xi1>, vector<16x128xf32>
    %cst_3 = arith.constant dense<0xFF800000> : vector<16xf32>
    %7 = vector.multi_reduction <maximumf>, %6, %cst_3 [1] : vector<16x128xf32> to vector<16xf32>
    %8 = vector.shape_cast %7 : vector<16xf32> to vector<16x1xf32>
    %9 = vector.broadcast %8 : vector<16x1xf32> to vector<16x128xf32>
    %10 = arith.subf %6, %9 : vector<16x128xf32>
    %11 = math.exp %10 : vector<16x128xf32>
    %cst_4 = arith.constant dense<0.000000e+00> : vector<16xf32>
    %12 = vector.multi_reduction <add>, %11, %cst_4 [1] : vector<16x128xf32> to vector<16xf32>
    %13 = vector.shape_cast %12 : vector<16xf32> to vector<16x1xf32>
    %14 = math.log %13 : vector<16x1xf32>
    %cst_5 = arith.constant 0.000000e+00 : f32
    %15 = vector.broadcast %cst_5 : f32 to vector<16x128xf32>
    %16 = arith.select %4, %10, %15 : vector<16x128xi1>, vector<16x128xf32>
    %cst_6 = arith.constant dense<0.000000e+00> : vector<16xf32>
    %17 = vector.multi_reduction <add>, %16, %cst_6 [1] : vector<16x128xf32> to vector<16xf32>
    %18 = vector.shape_cast %17 : vector<16xf32> to vector<16x1xf32>
    %19 = vector.broadcast %1 : vector<16x1xi32> to vector<16x128xi32>
    %20 = arith.cmpi eq, %2, %19 : vector<16x128xi32>
    %cst_7 = arith.constant 0.000000e+00 : f32
    %21 = vector.broadcast %cst_7 : f32 to vector<16x128xf32>
    %22 = arith.select %20, %10, %21 : vector<16x128xi1>, vector<16x128xf32>
    %cst_8 = arith.constant dense<0.000000e+00> : vector<16xf32>
    %23 = vector.multi_reduction <add>, %22, %cst_8 [1] : vector<16x128xf32> to vector<16xf32>
    %24 = vector.shape_cast %23 : vector<16xf32> to vector<16x1xf32>
    %cst_9 = arith.constant 1.000000e+00 : f32
    %cst_10 = arith.constant 1.000000e-01 : f32
    %25 = arith.subf %cst_9, %cst_10 : f32
    %cst_11 = arith.constant 0.000000e+00 : f32
    %26 = arith.subf %cst_11, %25 : f32
    %27 = arith.subf %24, %14 : vector<16x1xf32>
    %28 = vector.broadcast %26 : f32 to vector<16x1xf32>
    %29 = arith.mulf %28, %27 : vector<16x1xf32>
    %cst_12 = arith.constant 1.000000e-01 : f32
    %cst_13 = arith.constant 1.600000e+01 : f32
    %30 = arith.divf %cst_12, %cst_13 : f32
    %cst_14 = arith.constant 1.600000e+01 : f32
    %31 = vector.broadcast %cst_14 : f32 to vector<16x1xf32>
    %32 = arith.mulf %31, %14 : vector<16x1xf32>
    %33 = arith.subf %18, %32 : vector<16x1xf32>
    %34 = vector.broadcast %30 : f32 to vector<16x1xf32>
    %35 = arith.mulf %34, %33 : vector<16x1xf32>
    %36 = arith.subf %29, %35 : vector<16x1xf32>
    %c16_i32_15 = arith.constant 16 : i32
    %37 = arith.muli %arg0, %c16_i32_15 : i32
    %38 = tpu.iota {dimensions = array<i32: 0>} : vector<16x1xi32>
    %39 = vector.broadcast %37 : i32 to vector<16x1xi32>
    %40 = arith.addi %39, %38 : vector<16x1xi32>
    %c8_i32 = arith.constant 8 : i32
    %41 = vector.broadcast %c8_i32 : i32 to vector<16x1xi32>
    %42 = arith.cmpi slt, %40, %41 : vector<16x1xi32>
    %cst_16 = arith.constant 0.000000e+00 : f32
    %43 = vector.broadcast %cst_16 : f32 to vector<16x1xf32>
    %44 = arith.select %42, %36, %43 : vector<16x1xi1>, vector<16x1xf32>
    %45 = vector.shape_cast %44 : vector<16x1xf32> to vector<1x16x1xf32>
    %cst_17 = arith.constant dense<0.000000e+00> : vector<1xf32>
    %46 = vector.multi_reduction <add>, %45, %cst_17 [1, 2] : vector<1x16x1xf32> to vector<1xf32>
    %47 = vector.shape_cast %46 : vector<1xf32> to vector<1x1x1xf32>
    %48 = vector.extract %47[0, 0, 0] : f32 from vector<1x1x1xf32>
    %49 = vector.broadcast %48 : f32 to vector<1x8x128xf32>
    %c0_18 = arith.constant 0 : index
    %c0_19 = arith.constant 0 : index
    %c0_20 = arith.constant 0 : index
    %50 = vector.load %arg3[%c0_18, %c0_19, %c0_20] : memref<1x8x128xf32, #tpu.memory_space<vmem>>, vector<1x8x128xf32>
    tpu.vector_store %arg3[%c0_18, %c0_19, %c0_20], %49 {strides = array<i32>} : memref<1x8x128xf32, #tpu.memory_space<vmem>>, vector<1x8x128xf32>,
    return
  }
  func.func @transform_0(%arg0: i32) -> (i32, i32) {
    %c0_i32 = arith.constant 0 : i32
    %c0_i32_0 = arith.constant 0 : i32
    return %arg0, %c0_i32 : i32, i32
  }
  func.func @transform_1(%arg0: i32) -> (i32, i32) {
    %c0_i32 = arith.constant 0 : i32
    %c0_i32_0 = arith.constant 0 : i32
    return %arg0, %c0_i32 : i32, i32
  }
  func.func @transform_2(%arg0: i32) -> (i32, i32, i32) {
    %c0_i32 = arith.constant 0 : i32
    %c0_i32_0 = arith.constant 0 : i32
    %c0_i32_1 = arith.constant 0 : i32
    return %arg0, %c0_i32, %c0_i32_0 : i32, i32, i32
  }
}

</mosaic_0001>

<bundles_post_ra>
// kernel: tpu_custom_call.1
= control target key start
LH: loop header
LB: loop body
LE: loop exit
PB: predicated region body
PF: predicated region fallthrough
CT: control target
= control target key end

     0   :  { %v16_v0 = vlaneseq  ;;  %s179_s0 = inlined_call_operand.vmem [shape: f32[16,128], index: 0, kind: input, shape index: {}]   ;;  %s180_s1 = inlined_call_operand.vmem [shape: s32[16,1], index: 1, kind: input, shape index: {}]   ;;  %s181_s2 = inlined_call_operand.hbm [shape: f32[1,8,128], index: 2, kind: output, shape index: {}]  }
   0x1   :  { %7 = vsyncpa [#allocation3], 0  ;;  %v144_v1 = vmov 0   ;;  %v12_v2 = vld [vmem:[%s179_s0] sm:$0xff]  ;;  %vm82_vm2 = vcmask 7168   ;;  %s145_s0 = smov [#allocation2]  }
   0x2   :  { %115 = vset.pattern.permute.xlu0 %v144_v1  ;;  %v17_v3 = vand.u32 127, %v16_v0  ;;  %v14_v5 = vld [vmem:[%s180_s1] sm:$0xff]  ;;  %s103_s1 = sshll.u32 %s145_s0, 4  ;;  %s104_s1 = int_to_ptr.vmem [resolvable:$true] %s103_s1 }
   0x3   :  { %s120_s14 = scalar_lea.vmem %s104_s1, 128  ;;  %p125_p1 = scmp.lt.s32.totalorder %s104_s1, %s104_s1 }
   0x4   :  { %vm18_vm0 = vcmp.lt.s32.totalorder %v17_v3, 16  ;;  %p121_p0 = scmp.ne.s32.totalorder %s104_s1, %s120_s14  ;;  %p126_p2 = scmp.lt.s32.totalorder %s120_s14, %s120_s14 }
   0x5   :  { %v19_v4 = vsel %vm18_vm0, %v12_v2, -inf }
   0x6   :  { %21 = vmax.xlane.f32.xlu0 %v19_v4  ;;  %p127_p3 = por %p126_p2, %p125_p1 }
   0x8   :  { %p128_p4 = pnand %p127_p3, %p121_p0 }
  0x1c   :  { %46 = vperm.xlu0 %115, %v14_v5  }
  0x93   :  { %v22_v6 = vpop.xlane.xlu0 %21 }
  0x94   :  { %v25_v7 = vsub.f32 %v19_v4, %v22_v6 }
  0x96   :  { %v27_v8 = vmul.f32 1.442695, %v25_v7  ;;  %v39_v11 = vsel %vm18_vm0, %v25_v7, 0.0 }
  0x98   :  { %116 = vpow2.f32 %v27_v8 }
  0x9b   :  { %v47_v10 = vpop.permute.xlu0 %46 }
  0x9c   :  { %vm51_vm1 = vcmp.eq.s32.totalorder %v17_v3, %v47_v10 }
  0x9d   :  { %v53_v12 = vsel %vm51_vm1, %v25_v7, 0.0 }
  0xa2   :  { %v117_v9 = vpop.eup %116 }
  0xa3   :  { %31 = vadd.xlane.f32.xlu1 %v117_v9 }
  0xa7   :  { %41 = vadd.xlane.f32.xlu1 %v39_v11 }
  0xab   :  { %55 = vadd.xlane.f32.xlu1 %v53_v12 }
 0x130   :  { %v32_v13 = vpop.xlane.xlu1 %31 }
 0x131   :  { %118 = vlog2.f32 %v32_v13 }
 0x134   :  { %v42_v14 = vpop.xlane.xlu1 %41 }
 0x138   :  { %v56_v17 = vpop.xlane.xlu1 %55 }
 0x13b   :  { %v119_v15 = vpop.eup %118 }
 0x13c   :  { %v36_v16 = vmul.f32 0.6931472, %v119_v15 }
 0x13e   :  { %v63_v18 = vmul.f32 16.0, %v36_v16  ;;  %v59_v19 = vsub.f32 %v56_v17, %v36_v16 }
 0x140   :  { %v65_v20 = vsub.f32 %v42_v14, %v63_v18  ;;  %v61_v22 = vmul.f32 -0.9, %v59_v19 }
 0x142   :  { %v67_v21 = vmul.f32 0.00625, %v65_v20 }
 0x144   :  { %v69_v23 = vsub.f32 %v61_v22, %v67_v21 }
 0x146   :  { %v83_v24 = vsel %vm82_vm2, %v69_v23, 0.0 }
 0x147   :  { %86 = vadd.xlane.f32.xlu1 %v83_v24 }
 0x1d4   :  { %v87_v25 = vpop.xlane.xlu1 %86 }
 0x1d5   :  { %v88_v26 = vrot.slane %v87_v25, 4 }
 0x1d7   :  { %v89_v27 = vadd.f32 %v88_v26, %v87_v25 }
 0x1d9   :  { %v90_v28 = vrot.slane %v89_v27, 2 }
 0x1db   :  { %v91_v29 = vadd.f32 %v90_v28, %v89_v27 }
 0x1dd   :  { %v92_v30 = vrot.slane %v91_v29, 1 }
 0x1df   :  { %v93_v31 = vadd.f32 %v92_v30, %v91_v29 }
 0x1e1   :  { %111 = vpush %v93_v31 }
 0x212   :  { %s112_s13 = spop %111 }
 0x213   :  { %v95_v32 = vstv %s112_s13 }
 0x214   :  { %96 = vst [vmem:[#allocation2] sm:$0xff] %v95_v32 }
 0x215   :  { %131 = shalt.err (!%p128_p4)
}
 0x216   :  { %s132_s17 = scalar_lea.hbm %s181_s2, 128 }
 0x217   :  { %p133_p5 = scmp.ne.s32.totalorder %s181_s2, %s132_s17  ;;  %p136_p6 = scmp.lt.u32.totalorder %s132_s17, %s181_s2 }
 0x219   :  { %p138_p7 = pnand %p136_p6, %p133_p5 }
 0x21b   :  { %141 = shalt.err (!%p138_p7)
}
 0x21c   :  { %106 = dma.vmem_to_hbm [thread:$0]  %s104_s1, 128, %s181_s2, [#allocation3]  }
 0x21d   :  { %142 = dma.done.wait [#allocation3], 128  }
 0x21e   :  { %143 = vsyncadd [#allocation3], 4294967168 }
 0x21f   :  { %110 = vsyncpa [#allocation3], 1 }

</bundles_post_ra>
